<compile_context>
chip_gen: v6e
topology: v6e:2x2x1
jax: 0.10.0
libtpu: 0.0.40
codegen_flags: <defaults>
</compile_context>

<pallas_src>
import jax
import jax.numpy as jnp
import numpy as np
from jax.experimental import pallas as pl
from jax.experimental.pallas import tpu as pltpu


def _noise_loss_kernel(pred_ref, target_ref, per_batch_ref, acc_ref):
    # pred_ref/target_ref : VMEM (TB, TN) tiles in the native input dtype
    # per_batch_ref       : VMEM (TB, 1) f32 output (written once, at the last k)
    # acc_ref             : VMEM (TB, 1) f32 scratch accumulator
    k = pl.program_id(1)

    @pl.when(k == 0)
    def _():
        acc_ref[...] = jnp.zeros_like(acc_ref)

    diff = pred_ref[...].astype(jnp.float32) - target_ref[...].astype(jnp.float32)
    acc_ref[...] += jnp.sum(diff * diff, axis=1, keepdims=True)

    @pl.when(k == pl.num_programs(1) - 1)
    def _():
        per_batch_ref[...] = acc_ref[...]


def _round_up(x, m):
    return ((x + m - 1) // m) * m


def _tiling(B, N, itemsize):
    """Pick (TB, TN, N_pad) tile sizes."""
    # Batch tile: split in two (multiple-of-8 sublanes) when possible so the
    # "parallel" batch axis can be sharded across v7x's two TensorCores.
    if B % 16 == 0:
        TB = B // 2
    else:
        TB = B
    # Lane tile: as big as possible while keeping 2 inputs x 2 pipeline buffers
    # well under the smallest default scoped VMEM (16 MiB on v5e).
    max_block_bytes = 2 * 1024 * 1024                       # per input, per buffer
    tn_cap = max(128, (max_block_bytes // max(1, TB * itemsize)) // 128 * 128)
    TN = min(tn_cap, _round_up(N, 128))
    N_pad = _round_up(N, TN)
    return TB, TN, N_pad


def noise_estimation_loss(pred, target, weight=1.0, reduction='mean'):
    """Pallas implementation of NoiseEstimationLoss.forward (NCHW inputs)."""
    assert pred.shape == target.shape and pred.ndim == 4
    B = pred.shape[0]
    N = int(np.prod(pred.shape[1:]))

    dtype = jnp.promote_types(pred.dtype, target.dtype)
    pred2 = pred.reshape(B, N).astype(dtype)
    target2 = target.reshape(B, N).astype(dtype)

    TB, TN, N_pad = _tiling(B, N, jnp.dtype(dtype).itemsize)
    if N_pad != N:
        # Zero-pad both operands: (0 - 0)^2 contributes nothing to the sum.
        pad = ((0, 0), (0, N_pad - N))
        pred2 = jnp.pad(pred2, pad)
        target2 = jnp.pad(target2, pad)

    grid = (B // TB, N_pad // TN)

    per_batch = pl.pallas_call(
        _noise_loss_kernel,
        out_shape=jax.ShapeDtypeStruct((B, 1), jnp.float32),
        grid_spec=pltpu.PrefetchScalarGridSpec(
            num_scalar_prefetch=0,
            grid=grid,
            in_specs=[
                pl.BlockSpec((TB, TN), lambda b, k: (b, k)),   # pred tile
                pl.BlockSpec((TB, TN), lambda b, k: (b, k)),   # target tile
            ],
            out_specs=pl.BlockSpec((TB, 1), lambda b, k: (b, 0)),
            scratch_shapes=[pltpu.VMEM((TB, 1), jnp.float32)],
        ),
        compiler_params=pltpu.CompilerParams(
            dimension_semantics=("parallel", "arbitrary"),
        ),
    )(pred2, target2)

    # Scalar weight applied once to the per-sample sums (O(B) work, done in XLA).
    per_batch = jnp.asarray(weight, jnp.float32) * per_batch[:, 0]

    if reduction == 'mean':
        return jnp.mean(per_batch)
    elif reduction == 'sum':
        return jnp.sum(per_batch)
    else:
        return per_batch


def _reference(pred, target, weight=1.0, reduction='mean'):
    lm = weight * (pred.astype(jnp.float32) - target.astype(jnp.float32)) ** 2
    per_batch = jnp.sum(lm, axis=(1, 2, 3))
    if reduction == 'mean':
        return jnp.mean(per_batch)
    elif reduction == 'sum':
        return jnp.sum(per_batch)
    return per_batch


if __name__ == "__main__":
    key = jax.random.PRNGKey(0)
    k1, k2, k3, k4 = jax.random.split(key, 4)

    # Case 1: f32, N divisible by 128.
    B, C, H, W = 2, 4, 16, 16
    pred = jax.random.normal(k1, (B, C, H, W), dtype=jnp.float32)
    target = jax.random.normal(k2, (B, C, H, W), dtype=jnp.float32)
    weight = 0.5

    for red in ('mean', 'sum', 'none'):
        out = jax.block_until_ready(noise_estimation_loss(pred, target, weight, red))
        ref = _reference(pred, target, weight, red)
        np.testing.assert_allclose(np.asarray(out), np.asarray(ref),
                                   rtol=1e-5, atol=1e-5)

    # Case 2: bf16 inputs (native dtype streamed into the kernel, cast in-kernel).
    pred_bf = pred.astype(jnp.bfloat16)
    target_bf = target.astype(jnp.bfloat16)
    out_bf = jax.block_until_ready(noise_estimation_loss(pred_bf, target_bf, weight, 'mean'))
    ref_bf = _reference(pred_bf, target_bf, weight, 'mean')
    np.testing.assert_allclose(np.asarray(out_bf), np.asarray(ref_bf),
                               rtol=1e-4, atol=1e-4)

    # Case 3: N not a multiple of 128 (exercises zero-padding of the lane axis).
    pred3 = jax.random.normal(k3, (2, 3, 10, 10), dtype=jnp.float32)
    target3 = jax.random.normal(k4, (2, 3, 10, 10), dtype=jnp.float32)
    out3 = jax.block_until_ready(noise_estimation_loss(pred3, target3, 1.0, 'mean'))
    ref3 = _reference(pred3, target3, 1.0, 'mean')
    np.testing.assert_allclose(np.asarray(out3), np.asarray(ref3),
                               rtol=1e-5, atol=1e-5)

    print("KERNEL_OK")
</pallas_src>

<mosaic_0001>
module attributes {stable_mosaic.version = 11 : i64} {
  func.func @_noise_loss_kernel(%arg0: i32, %arg1: i32, %arg2: memref<2x1024xf32, #tpu.memory_space<vmem>>, %arg3: memref<2x1024xf32, #tpu.memory_space<vmem>>, %arg4: memref<2x1xf32, #tpu.memory_space<vmem>>, %arg5: memref<2x1xf32, #tpu.memory_space<vmem>>) attributes {dimension_semantics = [#tpu.dimension_semantics<parallel>, #tpu.dimension_semantics<arbitrary>], iteration_bounds = array<i64: 1, 1>, scalar_prefetch = 0 : i64, scratch_operands = 1 : i64, tpu.core_type = #tpu.core_type<tc>, window_params = [{transform_indices = @transform_0, window_bounds = array<i64: 2, 1024>}, {transform_indices = @transform_1, window_bounds = array<i64: 2, 1024>}, {transform_indices = @transform_2, window_bounds = array<i64: 2, 1>}]} {
    %c0_i32 = arith.constant 0 : i32
    %0 = arith.cmpi eq, %arg1, %c0_i32 : i32
    %1 = arith.extui %0 : i1 to i32
    %c0_i32_0 = arith.constant 0 : i32
    %2 = arith.cmpi ne, %1, %c0_i32_0 : i32
    scf.if %2 {
      %cst_10 = arith.constant 0.000000e+00 : f32
      %15 = vector.broadcast %cst_10 : f32 to vector<2x1xf32>
      %c0_11 = arith.constant 0 : index
      %c0_12 = arith.constant 0 : index
      %16 = vector.load %arg5[%c0_11, %c0_12] : memref<2x1xf32, #tpu.memory_space<vmem>>, vector<2x1xf32>
      tpu.vector_store %arg5[%c0_11, %c0_12], %15 {strides = array<i32>} : memref<2x1xf32, #tpu.memory_space<vmem>>, vector<2x1xf32>,
    } else {
    }
    %c0 = arith.constant 0 : index
    %c0_1 = arith.constant 0 : index
    %3 = vector.load %arg2[%c0, %c0_1] : memref<2x1024xf32, #tpu.memory_space<vmem>>, vector<2x1024xf32>
    %c0_2 = arith.constant 0 : index
    %c0_3 = arith.constant 0 : index
    %4 = vector.load %arg3[%c0_2, %c0_3] : memref<2x1024xf32, #tpu.memory_space<vmem>>, vector<2x1024xf32>
    %5 = arith.subf %3, %4 : vector<2x1024xf32>
    %c0_4 = arith.constant 0 : index
    %c0_5 = arith.constant 0 : index
    %6 = vector.load %arg5[%c0_4, %c0_5] : memref<2x1xf32, #tpu.memory_space<vmem>>, vector<2x1xf32>
    %7 = arith.mulf %5, %5 : vector<2x1024xf32>
    %cst = arith.constant dense<0.000000e+00> : vector<2xf32>
    %8 = vector.multi_reduction <add>, %7, %cst [1] : vector<2x1024xf32> to vector<2xf32>
    %9 = vector.shape_cast %8 : vector<2xf32> to vector<2x1xf32>
    %10 = arith.addf %6, %9 : vector<2x1xf32>
    %c0_6 = arith.constant 0 : index
    %c0_7 = arith.constant 0 : index
    %11 = vector.load %arg5[%c0_6, %c0_7] : memref<2x1xf32, #tpu.memory_space<vmem>>, vector<2x1xf32>
    tpu.vector_store %arg5[%c0_6, %c0_7], %10 {strides = array<i32>} : memref<2x1xf32, #tpu.memory_space<vmem>>, vector<2x1xf32>,
    %c0_i32_8 = arith.constant 0 : i32
    %12 = arith.cmpi eq, %arg1, %c0_i32_8 : i32
    %13 = arith.extui %12 : i1 to i32
    %c0_i32_9 = arith.constant 0 : i32
    %14 = arith.cmpi ne, %13, %c0_i32_9 : i32
    scf.if %14 {
      %c0_10 = arith.constant 0 : index
      %c0_11 = arith.constant 0 : index
      %15 = vector.load %arg5[%c0_10, %c0_11] : memref<2x1xf32, #tpu.memory_space<vmem>>, vector<2x1xf32>
      %c0_12 = arith.constant 0 : index
      %c0_13 = arith.constant 0 : index
      %16 = vector.load %arg4[%c0_12, %c0_13] : memref<2x1xf32, #tpu.memory_space<vmem>>, vector<2x1xf32>
      tpu.vector_store %arg4[%c0_12, %c0_13], %15 {strides = array<i32>} : memref<2x1xf32, #tpu.memory_space<vmem>>, vector<2x1xf32>,
    } else {
    }
    return
  }
  func.func @transform_0(%arg0: i32, %arg1: i32) -> (i32, i32) {
    %c0_i32 = arith.constant 0 : i32
    return %arg0, %arg1 : i32, i32
  }
  func.func @transform_1(%arg0: i32, %arg1: i32) -> (i32, i32) {
    %c0_i32 = arith.constant 0 : i32
    return %arg0, %arg1 : i32, i32
  }
  func.func @transform_2(%arg0: i32, %arg1: i32) -> (i32, i32) {
    %c0_i32 = arith.constant 0 : i32
    %c0_i32_0 = arith.constant 0 : i32
    return %arg0, %c0_i32 : i32, i32
  }
}

</mosaic_0001>

<bundles_post_ra>
// kernel: tpu_custom_call.1
= control target key start
LH: loop header
LB: loop body
LE: loop exit
PB: predicated region body
PF: predicated region fallthrough
CT: control target
= control target key end

     0   :  { %7 = vsyncpa [#allocation4], 0  ;;  %s213_s0 = inlined_call_operand.hbm [shape: f32[2,1024], index: 0, kind: input, shape index: {}]   ;;  %s214_s1 = inlined_call_operand.hbm [shape: f32[2,1024], index: 1, kind: input, shape index: {}]   ;;  %s215_s2 = inlined_call_operand.vmem [shape: f32[2,1], index: 2, kind: output, shape index: {}]  }
   0x1   :  { %8 = vsyncpa [#allocation6], 0  ;;  %s174_s9 = smov [#allocation3]   ;;  %s175_s11 = smov [#allocation5]  }
   0x2   :  { %s15_s10 = sshll.u32 %s174_s9, 4  ;;  %s25_s12 = sshll.u32 %s175_s11, 4  ;;  %s16_s10 = int_to_ptr.vmem [resolvable:$true] %s15_s10  ;;  %s26_s12 = int_to_ptr.vmem [resolvable:$true] %s25_s12 }
   0x3   :  { %s138_s13 = scalar_lea.vmem %s16_s10, 256  ;;  %p143_p1 = scmp.lt.s32.totalorder %s16_s10, %s16_s10 }
   0x4   :  { %p139_p0 = scmp.ne.s32.totalorder %s16_s10, %s138_s13  ;;  %p144_p2 = scmp.lt.s32.totalorder %s138_s13, %s138_s13 }
   0x6   :  { %p145_p3 = por %p144_p2, %p143_p1 }
   0x8   :  { %p146_p4 = pnand %p145_p3, %p139_p0 }
   0xa   :  { %149 = shalt.err (!%p146_p4)
}
   0xb   :  { %18 = dma.hbm_to_vmem [thread:$0]  %s213_s0, 256, %s16_s10, [#allocation4]  }
   0xc   :  { %s158_s16 = scalar_lea.vmem %s26_s12, 256  ;;  %p163_p6 = scmp.lt.s32.totalorder %s26_s12, %s26_s12 }
   0xd   :  { %p159_p5 = scmp.ne.s32.totalorder %s26_s12, %s158_s16  ;;  %p164_p7 = scmp.lt.s32.totalorder %s158_s16, %s158_s16 }
   0xf   :  { %p165_p8 = por %p164_p7, %p163_p6 }
  0x11   :  { %p166_p9 = pnand %p165_p8, %p159_p5 }
  0x13   :  { %169 = shalt.err (!%p166_p9)
}
  0x14   :  { %28 = dma.hbm_to_vmem [thread:$0]  %s214_s1, 256, %s26_s12, [#allocation6]  }
  0x15   :  { %170 = dma.done.wait [#allocation4], 256  }
  0x16   :  { %171 = vsyncadd [#allocation4], 4294967040 }
  0x17   :  { %172 = dma.done.wait [#allocation6], 256  }
  0x18   :  { %173 = vsyncadd [#allocation6], 4294967040  ;;  %v56_v0 = vlaneseq  ;;  %vm39_vm0 = vcmask 1024   ;;  %v176_v1 = vmov 1983009808   ;;  %v177_v3 = vmov 0.0  }
  0x19   :  { %v54_v2 = vunpack.c.l.s4 %v176_v1  ;;  %40 = vst.msk [vmem:[#allocation2] sm:$0x3] %vm39_vm0, %v177_v3  ;;  %v41_v6 = vld [vmem:[#allocation3] sm:$0xff]  ;;  %v42_v7 = vld [vmem:[#allocation3 + $0x8] sm:$0xff]  ;;  %v43_v8 = vld [vmem:[#allocation5] sm:$0xff]  ;;  %vm94_vm1 = vcmask 1041408  }
  0x1a   :  { %v57_v5 = vshrl.u32 %v56_v0, 7  ;;  %v44_v9 = vld [vmem:[#allocation5 + $0x8] sm:$0xff]  ;;  %v45_v10 = vsub.f32 %v41_v6, %v43_v8 }
  0x1b   :  { %v55_v4 = vunpack.c.0.s8 %v54_v2  ;;  %v46_v12 = vsub.f32 %v42_v7, %v44_v9 }
  0x1c   :  { %v48_v13 = vmul.f32 %v45_v10, %v45_v10 }
  0x1d   :  { %v58_v11 = vsub.s32 %v55_v4, %v57_v5  ;;  %v49_v14 = vmul.f32 %v46_v12, %v46_v12 }
  0x1e   :  { %v52_v15 = vcombine.high %v48_v13, %v48_v13 }
  0x1f   :  { %v59_v16 = vrot.slane %v48_v13, %v58_v11  ;;  %v69_v17 = vcombine.high %v49_v14, %v49_v14  ;;  %v76_v20 = vrot.slane %v49_v14, %v58_v11 }
  0x20   :  { %v66_v18 = vrot.slane %v52_v15, %v58_v11  ;;  %v47_v40 = vld [vmem:[#allocation2] sm:$0x3] }
  0x21   :  { %v67_v19 = vcombine.high %v59_v16, %v59_v16  ;;  %v95_v21 = vsel %vm94_vm1, %v59_v16, 0.0  ;;  %v83_v26 = vrot.slane %v69_v17, %v58_v11  ;;  %v84_v27 = vcombine.high %v76_v20, %v76_v20 }
  0x22   :  { %v68_v22 = vcombine.high %v66_v18, %v66_v18  ;;  %v98_v24 = vsel %vm94_vm1, %v66_v18, 0.0  ;;  %v102_v30 = vsel %vm94_vm1, %v76_v20, 0.0 }
  0x23   :  { %v96_v23 = vsel %vm94_vm1, %v67_v19, 0.0  ;;  %v85_v32 = vcombine.high %v83_v26, %v83_v26  ;;  %v104_v33 = vsel %vm94_vm1, %v84_v27, 0.0  ;;  %v106_v35 = vsel %vm94_vm1, %v83_v26, 0.0 }
  0x24   :  { %v97_v25 = vadd.f32 %v96_v23, %v95_v21  ;;  %v100_v28 = vsel %vm94_vm1, %v68_v22, 0.0 }
  0x25   :  { %v108_v37 = vsel %vm94_vm1, %v85_v32, 0.0 }
  0x26   :  { %v99_v29 = vadd.f32 %v98_v24, %v97_v25 }
  0x28   :  { %v101_v31 = vadd.f32 %v100_v28, %v99_v29 }
  0x2a   :  { %v103_v34 = vadd.f32 %v102_v30, %v101_v31 }
  0x2c   :  { %v105_v36 = vadd.f32 %v104_v33, %v103_v34 }
  0x2e   :  { %v107_v38 = vadd.f32 %v106_v35, %v105_v36 }
  0x30   :  { %v109_v39 = vadd.f32 %v108_v37, %v107_v38 }
  0x32   :  { %110 = vadd.xlane.f32.xlu0 %v109_v39 }
  0xbb   :  { %v111_v41 = vpop.xlane.xlu0 %110 }
  0xbc   :  { %v112_v42 = vadd.f32 %v111_v41, %v47_v40 }
  0xbe   :  { %114 = vst.msk [vmem:[#allocation2] sm:$0x3] %vm39_vm0, %v112_v42 }
  0xc5   :  { %v118_v43 = vld [vmem:[#allocation2] sm:$0x3] }
  0xc6   :  { %119 = vst.msk [vmem:[%s215_s2] sm:$0x3] %vm39_vm0, %v118_v43 }
  0xc7   :  { %124 = vsyncpa [#allocation4], 1 }
  0xc8   :  { %125 = vsyncpa [#allocation6], 1 }

</bundles_post_ra>
